<compile_context>
chip_gen: v6e
topology: v6e:2x2x1
jax: 0.10.0
libtpu: 0.0.40
codegen_flags: <defaults>
</compile_context>

<pallas_src>
import jax
import jax.numpy as jnp
import numpy as np
from jax import lax
from jax.experimental import pallas as pl
from jax.experimental.pallas import tpu as pltpu


def _self_attn_kernel(x_ref, wq_ref, bq_ref, wk_ref, bk_ref, wv_ref, bv_ref,
                      gamma_ref, out_ref, attn_ref, k_scr, v_scr):
    qi = pl.program_id(1)
    tq = out_ref.shape[2]

    # --- key / value projections: computed once per batch element -----------
    # The query axis is the innermost "arbitrary" grid axis, so qi == 0 runs
    # before the remaining query tiles of the same batch element on this core.
    @pl.when(qi == 0)
    def _():
        xb = x_ref[0].astype(jnp.bfloat16)                         # (C, N)
        k_scr[...] = (jnp.dot(wk_ref[...], xb,
                              preferred_element_type=jnp.float32)
                      + bk_ref[...]).astype(jnp.bfloat16)          # (C8, N)
        v_scr[...] = (jnp.dot(wv_ref[...], xb,
                              preferred_element_type=jnp.float32)
                      + bv_ref[...]).astype(jnp.bfloat16)          # (C, N)

    # --- query projection for this query tile only ---------------------------
    q_start = pl.multiple_of(qi * tq, tq)
    x_q = x_ref[0, :, pl.ds(q_start, tq)]                          # (C, TQ) f32
    q = (jnp.dot(wq_ref[...], x_q.astype(jnp.bfloat16),
                 preferred_element_type=jnp.float32)
         + bq_ref[...])                                            # (C8, TQ)

    # energy[i, j] = <q[:, i], k[:, j]>  -> (TQ, N); contraction on axis 0 of
    # both operands (no materialized transpose of q).
    energy = lax.dot_general(
        q.astype(jnp.bfloat16), k_scr[...],
        dimension_numbers=(((0,), (0,)), ((), ())),
        preferred_element_type=jnp.float32)

    # Row softmax over the full key axis (matches nn.Softmax(dim=-1)).
    # TODO(synk): for very large N (>= ~8-16K) switch to an online-softmax
    # (flash-style) loop over key tiles to cap VMEM at O(TQ*TK).
    energy = energy - jnp.max(energy, axis=-1, keepdims=True)
    e = jnp.exp(energy)
    attn = e * pl.reciprocal(jnp.sum(e, axis=-1, keepdims=True), approx=True)

    # out[:, i] = sum_j v[:, j] * attn[i, j]  (== v @ attn.T); contraction on
    # the lane axis of both operands, again no materialized transpose.
    out = lax.dot_general(
        v_scr[...], attn.astype(jnp.bfloat16),
        dimension_numbers=(((1,), (1,)), ((), ())),
        preferred_element_type=jnp.float32)                        # (C, TQ)

    gamma = gamma_ref[0]
    out_ref[0] = gamma * out + x_q
    attn_ref[0] = attn.astype(attn_ref.dtype)


def self_attn_pallas(x_nchw, wq, bq, wk, bk, wv, bv, gamma, *,
                     tq=256, attn_dtype=jnp.float32):
    """x_nchw: (B, C, W, H) f32.  Returns (out (B,C,W,H) f32, attn (B,N,N))."""
    B, C, W, H = x_nchw.shape
    N = W * H
    C8 = wq.shape[0]

    # Query-tile size: lane-dense (multiple of 128) and dividing N; fall back
    # to a single tile for small / irregular spatial sizes.
    tq = min(tq, N)
    if tq % 128 != 0 or N % tq != 0:
        tq = N
    nq = N // tq

    x_flat = x_nchw.reshape(B, C, N).astype(jnp.float32)
    # bf16 MXU operands; biases stay f32 and are added to the f32 accumulator.
    wq_b = wq.astype(jnp.bfloat16)
    wk_b = wk.astype(jnp.bfloat16)
    wv_b = wv.astype(jnp.bfloat16)
    bq2 = bq.reshape(C8, 1).astype(jnp.float32)
    bk2 = bk.reshape(C8, 1).astype(jnp.float32)
    bv2 = bv.reshape(C, 1).astype(jnp.float32)
    gamma1 = gamma.reshape(1).astype(jnp.float32)

    attn_bytes = jnp.dtype(attn_dtype).itemsize
    # Per-step VMEM budget (double-buffered pipeline blocks + scratch + softmax
    # intermediates) with 2x margin; capped at 48 MiB so the same tiling keeps
    # headroom inside v7x's 64 MiB VMEM.
    est = (2 * C * N * 4                       # x block (double-buffered, f32)
           + (C8 + C) * N * 2                  # k/v bf16 scratch
           + 4 * tq * N * 4                    # energy/exp/attn intermediates
           + 2 * C * tq * 4                    # out tile (double-buffered)
           + 2 * tq * N * attn_bytes           # attn tile (double-buffered)
           + (2 * C8 * C + C * C) * 2 + (2 * C8 + C) * 4)
    vmem_limit = int(min(max(2 * est, 32 * 1024 * 1024), 48 * 1024 * 1024))

    flops = 2 * B * N * (2 * C8 * C + C * C) + 2 * B * N * N * (C8 + C)
    bytes_accessed = (4 * B * C * N * 2 + attn_bytes * B * N * N
                      + 2 * (2 * C8 * C + C * C) + 4 * (2 * C8 + C + 1))

    out_flat, attn = pl.pallas_call(
        _self_attn_kernel,
        out_shape=(jax.ShapeDtypeStruct((B, C, N), jnp.float32),
                   jax.ShapeDtypeStruct((B, N, N), attn_dtype)),
        grid=(B, nq),
        in_specs=[
            pl.BlockSpec((1, C, N), lambda b, q: (b, 0, 0)),    # x (full row)
            pl.BlockSpec((C8, C), lambda b, q: (0, 0)),         # Wq (bf16)
            pl.BlockSpec((C8, 1), lambda b, q: (0, 0)),         # bq
            pl.BlockSpec((C8, C), lambda b, q: (0, 0)),         # Wk (bf16)
            pl.BlockSpec((C8, 1), lambda b, q: (0, 0)),         # bk
            pl.BlockSpec((C, C), lambda b, q: (0, 0)),          # Wv (bf16)
            pl.BlockSpec((C, 1), lambda b, q: (0, 0)),          # bv
            pl.BlockSpec(memory_space=pltpu.MemorySpace.SMEM),  # gamma scalar
        ],
        out_specs=(
            pl.BlockSpec((1, C, tq), lambda b, q: (b, 0, q)),
            pl.BlockSpec((1, tq, N), lambda b, q: (b, q, 0)),
        ),
        scratch_shapes=[
            pltpu.VMEM((C8, N), jnp.bfloat16),   # cached key projection
            pltpu.VMEM((C, N), jnp.bfloat16),    # cached value projection
        ],
        compiler_params=pltpu.CompilerParams(
            # Batch axis parallel (megacore on v7x); the query axis must stay
            # "arbitrary" so the pl.when(q==0) k/v-scratch init always runs
            # before the later query tiles of the same batch element.
            dimension_semantics=("parallel", "arbitrary"),
            vmem_limit_bytes=vmem_limit),
        cost_estimate=pl.CostEstimate(
            flops=flops, transcendentals=B * N * N,
            bytes_accessed=bytes_accessed),
    )(x_flat, wq_b, bq2, wk_b, bk2, wv_b, bv2, gamma1)

    return out_flat.reshape(B, C, W, H), attn


def self_attn_reference(x_nchw, wq, bq, wk, bk, wv, bv, gamma):
    """Pure-JAX f32 reference mirroring the PyTorch forward."""
    B, C, W, H = x_nchw.shape
    N = W * H
    x = x_nchw.reshape(B, C, N)
    q = jnp.einsum('oc,bcn->bon', wq, x) + bq[None, :, None]   # (B, C8, N)
    k = jnp.einsum('oc,bcn->bon', wk, x) + bk[None, :, None]   # (B, C8, N)
    v = jnp.einsum('oc,bcn->bon', wv, x) + bv[None, :, None]   # (B, C,  N)
    energy = jnp.einsum('bci,bcj->bij', q, k)                  # (B, N, N)
    attn = jax.nn.softmax(energy, axis=-1)
    out = jnp.einsum('bcj,bij->bci', v, attn)                  # (B, C, N)
    out = gamma[0] * out + x
    return out.reshape(B, C, W, H), attn


if __name__ == "__main__":
    # Small shapes consistent with the module (in_dim divisible by 8); spatial
    # 16x16 gives N=256 so the query-tiled path (2 query tiles of 128) runs.
    B, C, W, H = 2, 16, 16, 16
    C8 = C // 8
    N = W * H

    key = jax.random.PRNGKey(0)
    kx, kwq, kbq, kwk, kbk, kwv, kbv = jax.random.split(key, 7)

    x = jax.random.normal(kx, (B, C, W, H), dtype=jnp.float32)
    wq = 0.1 * jax.random.normal(kwq, (C8, C), dtype=jnp.float32)
    bq = 0.1 * jax.random.normal(kbq, (C8,), dtype=jnp.float32)
    wk = 0.1 * jax.random.normal(kwk, (C8, C), dtype=jnp.float32)
    bk = 0.1 * jax.random.normal(kbk, (C8,), dtype=jnp.float32)
    wv = 0.1 * jax.random.normal(kwv, (C, C), dtype=jnp.float32)
    bv = 0.1 * jax.random.normal(kbv, (C,), dtype=jnp.float32)
    # PyTorch inits gamma to zero; use a nonzero value so the attention path
    # actually contributes to the output check.
    gamma = jnp.array([0.5], dtype=jnp.float32)

    out, attn = self_attn_pallas(x, wq, bq, wk, bk, wv, bv, gamma, tq=128)
    out = jax.block_until_ready(out)
    attn = jax.block_until_ready(attn)

    out_ref, attn_ref = self_attn_reference(x, wq, bq, wk, bk, wv, bv, gamma)

    assert out.shape == (B, C, W, H)
    assert attn.shape == (B, N, N)
    # bf16 MXU operands + approximate softmax reciprocal -> relaxed tolerance
    # vs. the f32 reference.
    np.testing.assert_allclose(np.asarray(out), np.asarray(out_ref),
                               rtol=2e-2, atol=2e-2)
    np.testing.assert_allclose(np.asarray(attn), np.asarray(attn_ref),
                               rtol=2e-2, atol=2e-2)

    print("KERNEL_OK")
</pallas_src>

<mosaic_0001>
module attributes {stable_mosaic.version = 11 : i64} {
  func.func @_self_attn_kernel(%arg0: i32, %arg1: i32, %arg2: memref<1x16x256xf32, #tpu.memory_space<vmem>>, %arg3: memref<2x16xbf16, #tpu.memory_space<vmem>>, %arg4: memref<2x1xf32, #tpu.memory_space<vmem>>, %arg5: memref<2x16xbf16, #tpu.memory_space<vmem>>, %arg6: memref<2x1xf32, #tpu.memory_space<vmem>>, %arg7: memref<16x16xbf16, #tpu.memory_space<vmem>>, %arg8: memref<16x1xf32, #tpu.memory_space<vmem>>, %arg9: memref<1xf32, #tpu.memory_space<smem>>, %arg10: memref<1x16x128xf32, #tpu.memory_space<vmem>>, %arg11: memref<1x128x256xf32, #tpu.memory_space<vmem>>, %arg12: memref<2x256xbf16, #tpu.memory_space<vmem>>, %arg13: memref<16x256xbf16, #tpu.memory_space<vmem>>) attributes {dimension_semantics = [#tpu.dimension_semantics<parallel>, #tpu.dimension_semantics<arbitrary>], iteration_bounds = array<i64: 2, 2>, scalar_prefetch = 0 : i64, scratch_operands = 2 : i64, tpu.core_type = #tpu.core_type<tc>, window_params = [{transform_indices = @transform_0, window_bounds = array<i64: 1, 16, 256>}, {pipeline_mode = #tpu.pipeline_mode<synchronous>, transform_indices = @transform_1, window_bounds = array<i64: 2, 16>}, {pipeline_mode = #tpu.pipeline_mode<synchronous>, transform_indices = @transform_2, window_bounds = array<i64: 2, 1>}, {pipeline_mode = #tpu.pipeline_mode<synchronous>, transform_indices = @transform_3, window_bounds = array<i64: 2, 16>}, {pipeline_mode = #tpu.pipeline_mode<synchronous>, transform_indices = @transform_4, window_bounds = array<i64: 2, 1>}, {pipeline_mode = #tpu.pipeline_mode<synchronous>, transform_indices = @transform_5, window_bounds = array<i64: 16, 16>}, {pipeline_mode = #tpu.pipeline_mode<synchronous>, transform_indices = @transform_6, window_bounds = array<i64: 16, 1>}, {transform_indices = @transform_7, window_bounds = array<i64: 1>}, {transform_indices = @transform_8, window_bounds = array<i64: 1, 16, 128>}, {transform_indices = @transform_9, window_bounds = array<i64: 1, 128, 256>}]} {
    %c0_i32 = arith.constant 0 : i32
    %0 = arith.cmpi eq, %arg1, %c0_i32 : i32
    %1 = arith.extui %0 : i1 to i32
    %c0_i32_0 = arith.constant 0 : i32
    %2 = arith.cmpi ne, %1, %c0_i32_0 : i32
    scf.if %2 {
      %c0_21 = arith.constant 0 : index
      %c0_22 = arith.constant 0 : index
      %c0_23 = arith.constant 0 : index
      %40 = vector.load %arg2[%c0_21, %c0_22, %c0_23] : memref<1x16x256xf32, #tpu.memory_space<vmem>>, vector<1x16x256xf32>
      %41 = vector.shape_cast %40 : vector<1x16x256xf32> to vector<16x256xf32>
      %42 = arith.truncf %41 : vector<16x256xf32> to vector<16x256xbf16>
      %c0_24 = arith.constant 0 : index
      %c0_25 = arith.constant 0 : index
      %43 = vector.load %arg5[%c0_24, %c0_25] : memref<2x16xbf16, #tpu.memory_space<vmem>>, vector<2x16xbf16>
      %cst_26 = arith.constant dense<0.000000e+00> : vector<2x256xf32>
      %44 = tpu.matmul %43, %42, %cst_26 {dimension_numbers = #tpu.dot_dimension_numbers<[1], [0], [0], [1], [0, 0, 1, 1], [], []>} : vector<2x16xbf16>, vector<16x256xbf16>, vector<2x256xf32> -> vector<2x256xf32>
      %c0_27 = arith.constant 0 : index
      %c0_28 = arith.constant 0 : index
      %45 = vector.load %arg6[%c0_27, %c0_28] : memref<2x1xf32, #tpu.memory_space<vmem>>, vector<2x1xf32>
      %46 = vector.broadcast %45 : vector<2x1xf32> to vector<2x256xf32>
      %47 = arith.addf %44, %46 : vector<2x256xf32>
      %48 = arith.truncf %47 : vector<2x256xf32> to vector<2x256xbf16>
      %c0_29 = arith.constant 0 : index
      %c0_30 = arith.constant 0 : index
      %49 = vector.load %arg12[%c0_29, %c0_30] : memref<2x256xbf16, #tpu.memory_space<vmem>>, vector<2x256xbf16>
      tpu.vector_store %arg12[%c0_29, %c0_30], %48 {strides = array<i32>} : memref<2x256xbf16, #tpu.memory_space<vmem>>, vector<2x256xbf16>,
      %c0_31 = arith.constant 0 : index
      %c0_32 = arith.constant 0 : index
      %50 = vector.load %arg7[%c0_31, %c0_32] : memref<16x16xbf16, #tpu.memory_space<vmem>>, vector<16x16xbf16>
      %cst_33 = arith.constant dense<0.000000e+00> : vector<16x256xf32>
      %51 = tpu.matmul %50, %42, %cst_33 {dimension_numbers = #tpu.dot_dimension_numbers<[1], [0], [0], [1], [0, 0, 1, 1], [], []>} : vector<16x16xbf16>, vector<16x256xbf16>, vector<16x256xf32> -> vector<16x256xf32>
      %c0_34 = arith.constant 0 : index
      %c0_35 = arith.constant 0 : index
      %52 = vector.load %arg8[%c0_34, %c0_35] : memref<16x1xf32, #tpu.memory_space<vmem>>, vector<16x1xf32>
      %53 = vector.broadcast %52 : vector<16x1xf32> to vector<16x256xf32>
      %54 = arith.addf %51, %53 : vector<16x256xf32>
      %55 = arith.truncf %54 : vector<16x256xf32> to vector<16x256xbf16>
      %c0_36 = arith.constant 0 : index
      %c0_37 = arith.constant 0 : index
      %56 = vector.load %arg13[%c0_36, %c0_37] : memref<16x256xbf16, #tpu.memory_space<vmem>>, vector<16x256xbf16>
      tpu.vector_store %arg13[%c0_36, %c0_37], %55 {strides = array<i32>} : memref<16x256xbf16, #tpu.memory_space<vmem>>, vector<16x256xbf16>,
    } else {
    }
    %c128_i32 = arith.constant 128 : i32
    %3 = arith.muli %arg1, %c128_i32 : i32
    %4 = tpu.assume_multiple %3, 128 : i32
    %c0 = arith.constant 0 : index
    %c0_1 = arith.constant 0 : index
    %5 = arith.index_cast %4 : i32 to index
    %6 = vector.load %arg2[%c0, %c0_1, %5] : memref<1x16x256xf32, #tpu.memory_space<vmem>>, vector<1x16x128xf32>
    %7 = vector.shape_cast %6 : vector<1x16x128xf32> to vector<16x128xf32>
    %c0_2 = arith.constant 0 : index
    %c0_3 = arith.constant 0 : index
    %8 = vector.load %arg3[%c0_2, %c0_3] : memref<2x16xbf16, #tpu.memory_space<vmem>>, vector<2x16xbf16>
    %9 = arith.truncf %7 : vector<16x128xf32> to vector<16x128xbf16>
    %cst = arith.constant dense<0.000000e+00> : vector<2x128xf32>
    %10 = tpu.matmul %8, %9, %cst {dimension_numbers = #tpu.dot_dimension_numbers<[1], [0], [0], [1], [0, 0, 1, 1], [], []>} : vector<2x16xbf16>, vector<16x128xbf16>, vector<2x128xf32> -> vector<2x128xf32>
    %c0_4 = arith.constant 0 : index
    %c0_5 = arith.constant 0 : index
    %11 = vector.load %arg4[%c0_4, %c0_5] : memref<2x1xf32, #tpu.memory_space<vmem>>, vector<2x1xf32>
    %12 = vector.broadcast %11 : vector<2x1xf32> to vector<2x128xf32>
    %13 = arith.addf %10, %12 : vector<2x128xf32>
    %14 = arith.truncf %13 : vector<2x128xf32> to vector<2x128xbf16>
    %c0_6 = arith.constant 0 : index
    %c0_7 = arith.constant 0 : index
    %15 = vector.load %arg12[%c0_6, %c0_7] : memref<2x256xbf16, #tpu.memory_space<vmem>>, vector<2x256xbf16>
    %cst_8 = arith.constant dense<0.000000e+00> : vector<128x256xf32>
    %16 = tpu.matmul %14, %15, %cst_8 {dimension_numbers = #tpu.dot_dimension_numbers<[0], [0], [1], [1], [0, 1, 1, 1], [], []>} : vector<2x128xbf16>, vector<2x256xbf16>, vector<128x256xf32> -> vector<128x256xf32>
    %cst_9 = arith.constant dense<0xFF800000> : vector<128xf32>
    %17 = vector.multi_reduction <maximumf>, %16, %cst_9 [1] : vector<128x256xf32> to vector<128xf32>
    %18 = vector.shape_cast %17 : vector<128xf32> to vector<128x1xf32>
    %19 = vector.broadcast %18 : vector<128x1xf32> to vector<128x256xf32>
    %20 = arith.subf %16, %19 : vector<128x256xf32>
    %21 = math.exp %20 : vector<128x256xf32>
    %cst_10 = arith.constant dense<0.000000e+00> : vector<128xf32>
    %22 = vector.multi_reduction <add>, %21, %cst_10 [1] : vector<128x256xf32> to vector<128xf32>
    %23 = vector.shape_cast %22 : vector<128xf32> to vector<128x1xf32>
    %24 = tpu.reciprocal %23 {approx = true} : vector<128x1xf32> -> vector<128x1xf32>
    %25 = vector.broadcast %24 : vector<128x1xf32> to vector<128x256xf32>
    %26 = arith.mulf %21, %25 : vector<128x256xf32>
    %c0_11 = arith.constant 0 : index
    %c0_12 = arith.constant 0 : index
    %27 = vector.load %arg13[%c0_11, %c0_12] : memref<16x256xbf16, #tpu.memory_space<vmem>>, vector<16x256xbf16>
    %28 = arith.truncf %26 : vector<128x256xf32> to vector<128x256xbf16>
    %cst_13 = arith.constant dense<0.000000e+00> : vector<16x128xf32>
    %29 = tpu.matmul %27, %28, %cst_13 {dimension_numbers = #tpu.dot_dimension_numbers<[1], [1], [0], [0], [0, 0, 1, 0], [], []>} : vector<16x256xbf16>, vector<128x256xbf16>, vector<16x128xf32> -> vector<16x128xf32>
    %c0_14 = arith.constant 0 : index
    %30 = memref.load %arg9[%c0_14] : memref<1xf32, #tpu.memory_space<smem>>
    %31 = vector.broadcast %30 : f32 to vector<16x128xf32>
    %32 = arith.mulf %31, %29 : vector<16x128xf32>
    %33 = arith.addf %32, %7 : vector<16x128xf32>
    %c0_15 = arith.constant 0 : index
    %c0_16 = arith.constant 0 : index
    %c0_17 = arith.constant 0 : index
    %34 = vector.load %arg10[%c0_15, %c0_16, %c0_17] : memref<1x16x128xf32, #tpu.memory_space<vmem>>, vector<1x16x128xf32>
    %35 = vector.shape_cast %34 : vector<1x16x128xf32> to vector<16x128xf32>
    %36 = vector.shape_cast %33 : vector<16x128xf32> to vector<1x16x128xf32>
    tpu.vector_store %arg10[%c0_15, %c0_16, %c0_17], %36 {strides = array<i32>} : memref<1x16x128xf32, #tpu.memory_space<vmem>>, vector<1x16x128xf32>,
    %c0_18 = arith.constant 0 : index
    %c0_19 = arith.constant 0 : index
    %c0_20 = arith.constant 0 : index
    %37 = vector.load %arg11[%c0_18, %c0_19, %c0_20] : memref<1x128x256xf32, #tpu.memory_space<vmem>>, vector<1x128x256xf32>
    %38 = vector.shape_cast %37 : vector<1x128x256xf32> to vector<128x256xf32>
    %39 = vector.shape_cast %26 : vector<128x256xf32> to vector<1x128x256xf32>
    tpu.vector_store %arg11[%c0_18, %c0_19, %c0_20], %39 {strides = array<i32>} : memref<1x128x256xf32, #tpu.memory_space<vmem>>, vector<1x128x256xf32>,
    return
  }
  func.func @transform_0(%arg0: i32, %arg1: i32) -> (i32, i32, i32) {
    %c0_i32 = arith.constant 0 : i32
    %c0_i32_0 = arith.constant 0 : i32
    %c0_i32_1 = arith.constant 0 : i32
    return %arg0, %c0_i32, %c0_i32_0 : i32, i32, i32
  }
  func.func @transform_1(%arg0: i32, %arg1: i32) -> (i32, i32) {
    %c0_i32 = arith.constant 0 : i32
    %c0_i32_0 = arith.constant 0 : i32
    %c0_i32_1 = arith.constant 0 : i32
    return %c0_i32, %c0_i32_0 : i32, i32
  }
  func.func @transform_2(%arg0: i32, %arg1: i32) -> (i32, i32) {
    %c0_i32 = arith.constant 0 : i32
    %c0_i32_0 = arith.constant 0 : i32
    %c0_i32_1 = arith.constant 0 : i32
    return %c0_i32, %c0_i32_0 : i32, i32
  }
  func.func @transform_3(%arg0: i32, %arg1: i32) -> (i32, i32) {
    %c0_i32 = arith.constant 0 : i32
    %c0_i32_0 = arith.constant 0 : i32
    %c0_i32_1 = arith.constant 0 : i32
    return %c0_i32, %c0_i32_0 : i32, i32
  }
  func.func @transform_4(%arg0: i32, %arg1: i32) -> (i32, i32) {
    %c0_i32 = arith.constant 0 : i32
    %c0_i32_0 = arith.constant 0 : i32
    %c0_i32_1 = arith.constant 0 : i32
    return %c0_i32, %c0_i32_0 : i32, i32
  }
  func.func @transform_5(%arg0: i32, %arg1: i32) -> (i32, i32) {
    %c0_i32 = arith.constant 0 : i32
    %c0_i32_0 = arith.constant 0 : i32
    %c0_i32_1 = arith.constant 0 : i32
    return %c0_i32, %c0_i32_0 : i32, i32
  }
  func.func @transform_6(%arg0: i32, %arg1: i32) -> (i32, i32) {
    %c0_i32 = arith.constant 0 : i32
    %c0_i32_0 = arith.constant 0 : i32
    %c0_i32_1 = arith.constant 0 : i32
    return %c0_i32, %c0_i32_0 : i32, i32
  }
  func.func @transform_7(%arg0: i32, %arg1: i32) -> i32 {
    %c0_i32 = arith.constant 0 : i32
    %c0_i32_0 = arith.constant 0 : i32
    return %c0_i32 : i32
  }
  func.func @transform_8(%arg0: i32, %arg1: i32) -> (i32, i32, i32) {
    %c0_i32 = arith.constant 0 : i32
    %c0_i32_0 = arith.constant 0 : i32
    return %arg0, %c0_i32, %arg1 : i32, i32, i32
  }
  func.func @transform_9(%arg0: i32, %arg1: i32) -> (i32, i32, i32) {
    %c0_i32 = arith.constant 0 : i32
    %c0_i32_0 = arith.constant 0 : i32
    return %arg0, %arg1, %c0_i32 : i32, i32, i32
  }
}

</mosaic_0001>

<bundles_post_ra>
// kernel: tpu_custom_call.1
= control target key start
LH: loop header
LB: loop body
LE: loop exit
PB: predicated region body
PF: predicated region fallthrough
CT: control target
= control target key end

     0   :  { %s2367_s0 = inlined_call_operand.hbm [shape: f32[2,16,256], index: 0, kind: input, shape index: {}]   ;;  %s2368_s1 = inlined_call_operand.vmem [shape: bf16[2,16], index: 1, kind: input, shape index: {}]   ;;  %s2369_s2 = inlined_call_operand.vmem [shape: f32[2,1], index: 2, kind: input, shape index: {}]   ;;  %s2370_s3 = inlined_call_operand.vmem [shape: bf16[2,16], index: 3, kind: input, shape index: {}]   ;;  %s2371_s4 = inlined_call_operand.vmem [shape: f32[2,1], index: 4, kind: input, shape index: {}]   ;;  %s2372_s5 = inlined_call_operand.vmem [shape: bf16[16,16], index: 5, kind: input, shape index: {}]   ;;  %s2373_s6 = inlined_call_operand.vmem [shape: f32[16,1], index: 6, kind: input, shape index: {}]   ;;  %s2374_s7 = inlined_call_operand.<no memory space> [shape: f32[1], index: 7, kind: input, shape index: {}]   ;;  %s2375_s8 = inlined_call_operand.hbm [shape: f32[2,16,256], index: 8, kind: output, shape index: {0}]   ;;  %s2376_s9 = inlined_call_operand.hbm [shape: f32[2,256,256], index: 9, kind: output, shape index: {1}]  }
   0x1   :  { %2386 = sst [smem:[#allocation20_spill]] %s2367_s0 }
   0x2   :  { %2387 = sst [smem:[#allocation21_spill]] %s2368_s1 }
   0x3   :  { %2388 = sst [smem:[#allocation22_spill]] %s2369_s2 }
   0x4   :  { %2389 = sst [smem:[#allocation23_spill]] %s2375_s8 }
   0x5   :  { %2390 = sst [smem:[#allocation24_spill]] %s2376_s9 }
   0x6   :  { %15 = sst [smem:[#allocation4]] %s2374_s7 }
   0x7   :  { %16 = vsyncpa [#allocation6], 0 }
   0x8   :  { %18 = vsyncpa [#allocation6 + $0x1], 0 }
   0x9   :  { %19 = vsyncpa [#allocation7], 0 }
   0xa   :  { %21 = vsyncpa [#allocation7 + $0x1], 0 }
   0xb   :  { %22 = vsyncpa [#allocation10], 0 }
   0xc   :  { %24 = vsyncpa [#allocation10 + $0x1], 0  ;;  %s1825_s11 = smov 0   ;;  %s1827_s12 = smov 0  }
   0xd   :  { %s1829_s13 = smov 0   ;;  %s1831_s14 = smov 0  }
   0xe   :  { %s1833_s15 = smov 0   ;;  %s1835_s16 = smov 0  }
   0xf   :  { %s1837_s17 = smov 0   ;;  %s1839_s7 = smov 0  }
  0x10   :  { %s1841_s18 = smov 0   ;;  %s1843_s19 = smov 0  }
  0x11   :  { %s1845_s20 = smov 0  }
  0x12 LB: > { %2391 = sst [smem:[#allocation14_spill]] %s1743_s7  ;;  %s1299_s21 = sadd.s32 4294967295, %s1755_s20   ;;  %s1755_s20 = sphi %s1845_s20, %s30_s20   ;;  %s1751_s19 = sphi %s1843_s19, %s2413_s19   ;;  %s1747_s18 = sphi %s1841_s18, %s2420_s18   ;;  %s1743_s7 = sphi %s1839_s7, %s2411_s7   ;;  %s1739_s17 = sphi %s1837_s17, %s2410_s17   ;;  %s1735_s16 = sphi %s1835_s16, %s2419_s16   ;;  %s1731_s15 = sphi %s1833_s15, %s2418_s15   ;;  %s1727_s14 = sphi %s1831_s14, %s2417_s14   ;;  %s1723_s13 = sphi %s1829_s13, %s2416_s13   ;;  %s1719_s12 = sphi %s1827_s12, %s2415_s12   ;;  %s1715_s11 = sphi %s1825_s11, %s2414_s11  }
  0x13   : > { %2392 = sst [smem:[#allocation15_spill]] %s1747_s18  ;;  %s1300_s22 = sadd.s32 4294967294, %s1755_s20  }
  0x14   : > { %2393 = sst [smem:[#allocation16_spill]] %s1751_s19  ;;  %s39_s23 = sadd.s32 1, %s1747_s18 }
  0x15   : > { %s42_s24 = sadd.s32 1, %s1751_s19  ;;  %p40_p0 = scmp.ge.s32.totalorder %s39_s23, 2 }
  0x16   : > { %s49_s25 = sadd.s32 1, %s1735_s16  ;;  %p56_p1 = scmp.ne.s32.totalorder %s1735_s16, %s1731_s15 }
  0x17   : > { %p57_p2 = scmp.eq.s32.totalorder %s1755_s20, 0  ;;  %s2422_s23 = smov (%p40_p0, %s39_s23), 0 }
  0x18   : > { %2394 = sst [smem:[#allocation17_spill]] %s2422_s23  ;;  %s2424_s24 = smov (!%p40_p0, %s42_s24), %s1751_s19 }
  0x19   : > { %p1889_p3 = por %p57_p2, %p56_p1  ;;  %p62_p4 = scmp.ne.s32.totalorder %s1731_s15, %s1727_s14 }
  0x1a   : > { %p44_p5 = scmp.ge.s32.totalorder %s2424_s24, 2  ;;  %p63_p6 = scmp.eq.s32.totalorder %s1299_s21, 0 }
  0x1b   : > { %s220_s27 = ssub.s32 %s1747_s18, %s2422_s23  ;;  %s224_s28 = sadd.s32 1, %s1723_s13 }
  0x1c   : > { %s2426_s24 = smov (%p44_p5, %s2424_s24), 0  ;;  %p1899_p7 = por %p63_p6, %p62_p4 }
  0x1d   : > { %2396 = sst [smem:[#allocation18_spill]] %s2426_s24  ;;  %p234_p8 = scmp.ne.s32.totalorder %s1723_s13, %s1719_s12 }
  0x1e   : > { %s46_s30 = ssub.s32 %s1751_s19, %s2426_s24  ;;  %p235_p9 = scmp.eq.s32.totalorder %s1299_s21, 3 }
  0x1f   : > { %p47_p10 = scmp.eq.s32.totalorder %s46_s30, 0  ;;  %s221_s10 = sor.u32 %s220_s27, %s46_s30 }
  0x20   : > { %p222_p11 = scmp.eq.s32.totalorder %s221_s10, 0  ;;  %p1907_p12 = por %p235_p9, %p234_p8 }
  0x21   : > { %s1912_s23 = scalar_select %p47_p10, %s1735_s16, %s49_s25  }
  0x22   : > { %s2398_s14 = scalar_select %p1907_p12, 1, 0 }
  0x23   : > { %s1915_s18 = scalar_select %p222_p11, %s1723_s13, %s224_s28  }
  0x24   : > { %2399 = sst [smem:[#allocation19_spill]] %s2398_s14  ;;  %p240_p13 = scmp.ne.s32.totalorder %s1719_s12, %s1715_s11 }
  0x25   : > { %p241_p0 = scmp.eq.s32.totalorder %s1300_s22, 3  ;;  %p1372_p1 = scmp.lt.s32.totalorder %s1755_s20, 4 }
  0x26   : > { %s310_s21 = sand.u32 1, %s1735_s16   ;;  %s1343_s30 = sshll.u32 %s1751_s19, 9 }
  0x27   : > { %p1920_p2 = por %p241_p0, %p240_p13  ;;  %s1303_s27 = sshll.u32 %s310_s21, 5 }
  0x28   : > { %s2401_s0 = sld [smem:[#allocation20_spill]]  ;;  %s314_s7 = scalar_lea.vmem [#allocation5], %s1303_s27 }
  0x29   : > { %s321_s14 = sshll.u32 %s314_s7, 4  ;;  %p1931_p4 = pnand %p1372_p1, %p1889_p3  ;;  %s322_s14 = int_to_ptr.vmem [resolvable:$true] %s321_s14 }
  0x2a   : > { %p1306_p5 = scmp.ge.s32.totalorder %s1755_s20, 1  ;;  %s311_s22 = scalar_lea.sflag [#allocation6], %s310_s21 }
  0x2b   : > { %p1579_p6 = pneg %p1931_p4  ;;  %s1590_s28 = scalar_lea.vmem %s322_s14, 512 }
  0x2c   : > { %p1591_p8 = scmp.ne.s32.totalorder %s322_s14, %s1590_s28  ;;  %s1757_s19 = smov [#allocation5]  }
  0x2d   : > { %s1595_s24 = sshll.u32 %s1757_s19, 4  ;;  %s1596_s24 = int_to_ptr.vmem [resolvable:$false] %s1595_s24 }
  0x2e   : > { %s320_s9 = scalar_lea.hbm %s2401_s0, %s1343_s30  ;;  %p1593_p9 = pnand %p1591_p8, %p1579_p6 }
  0x2f   : > { %s1597_s27 = scalar_lea.vmem %s1596_s24, 1024  ;;  %p1598_p11 = scmp.lt.s32.totalorder %s322_s14, %s1596_s24 }
  0x30   : > { %p1594_p10 = pneg %p1593_p9  ;;  %p1599_p13 = scmp.lt.s32.totalorder %s1597_s27, %s1590_s28 }
  0x32   : > { %p1600_p0 = por %p1599_p13, %p1598_p11 }
  0x34   : > { %p1601_p3 = pnand %p1600_p0, %p1594_p10 }
  0x36   : > { %1604 = shalt.err (!%p1601_p3)
}
  0x37   : > { %s1758_s7 = smov 256   ;;  %s1759_s26 = smov 16  }
  0x38   : > { %1364 = dma.hbm_to_vmem [thread:$0]  (!%p1931_p4), %s320_s9, 512, %s322_s14, %s311_s22, %s1758_s7, %s1758_s7, %s1759_s26  }
  0x39   : > { %p329_p1 = scmp.lt.s32.totalorder %s1755_s20, 5 }
  0x3b   : > { %p330_p6 = pnand %p1306_p5, %p329_p1 }
  0x3c   : > { %s335_s19 = sand.u32 (!%p330_p6), 1, %s1731_s15  }
  0x3d   : > { %333 = sbr.rel (%p330_p6) target bundleno = 1443 (0x5a3), region = 52  ;;  %s1307_s21 = sshll.u32 (!%p330_p6), %s335_s19, 5 }
  0x3e   : > { %s336_s30 = scalar_lea.sflag (!%p330_p6), [#allocation6], %s335_s19  ;;  %s1944_s10 = scalar_lea.vmem (!%p330_p6), [#allocation5], %s1307_s21 }
  0x42   : > { %1702 = dma.done.wait (%p1899_p7), %s336_s30, 512  }
  0x43   : > { %1704 = vsyncadd (%p1899_p7), %s336_s30, 4294966784  ;;  %s1951_s28 = sand.u32 1, %s1719_s12   ;;  %p1310_p4 = scmp.ne.s32.totalorder %s1739_s17, 0 }
  0x44   : > { %s1308_s9 = sshll.u32 %s1951_s28, 4  ;;  %s1309_s14 = sshll.u32 %s1951_s28, 8 }
  0x45   : > { %s1955_s25 = scalar_lea.vmem [#allocation8], %s1308_s9  ;;  %s1957_s22 = scalar_lea.vmem [#allocation9], %s1309_s14 }
  0x46   : > { %384 = sbr.rel (%p1310_p4) target bundleno = 286 (0x11e), region = 60 }
  0x4b   : > { %v386_v0 = vld [vmem:[%s1944_s10 + $0x8] sm:$0xff]  ;;  %v388_v1 = vld [vmem:[%s1944_s10 + $0x18] sm:$0xff]  ;;  %v385_v2 = vld [vmem:[%s1944_s10] sm:$0xff]  ;;  %v1760_v5 = vmov 0   ;;  %vm398_vm0 = vcmask 130048   ;;  %v451_v15 = vlaneseq }
  0x4c   : > { %v390_v3 = vpack.c.bf16 %v388_v1, %v386_v0  ;;  %v387_v4 = vld [vmem:[%s1944_s10 + $0x10] sm:$0xff]  ;;  %434 = vmatprep.mubr.bf16.mxu0 %v1760_v5  ;;  %518 = vmatprep.mubr.bf16.mxu1 %v1760_v5  ;;  %v392_v7 = vld [vmem:[%s2371_s4] sm:$0x3]  ;;  %v1761_v13 = vmov 1966171168  }
  0x4d   : > { %v389_v6 = vpack.c.bf16 %v387_v4, %v385_v2  ;;  %1474 = vset.pattern.permute.xlu0 %v1760_v5  ;;  %1475 = vset.pattern.permute.xlu1 %v1760_v5  ;;  %v1476_v8 = vld [vmem:[%s2372_s5] sm:$0xff]   ;;  %v467_v9 = vld [vmem:[%s2373_s6 + $0x8] sm:$0xff]  ;;  %v449_v14 = vunpack.c.l.s4 %v1761_v13  ;;  %v452_v18 = vshrl.u32 %v451_v15, 7 }
  0x4e   : > { %416 = vmatprep.subr.bf16.mxu0 %v390_v3  ;;  %500 = vmatprep.subr.bf16.mxu1 %v390_v3  ;;  %v391_v10 = vld [vmem:[%s2370_s3] sm:$0x1] }
  0x4f   : > { %417 = vmatpush1.bf16.msra.mxu0 %v389_v6  ;;  %501 = vmatpush1.bf16.msra.mxu1 %v389_v6  ;;  %v466_v11 = vld [vmem:[%s2373_s6] sm:$0xff]  ;;  %v450_v17 = vunpack.c.0.s8 %v449_v14 }
  0x50   : > { %395 = vperm.xlu0 %1474, %v392_v7   ;;  %475 = vperm.xlu1 %1475, %v467_v9  }
  0x51   : > { %v453_v26 = vsub.s32 %v450_v17, %v452_v18 }
  0x52   : > { %1311 = vmatmul.mubr.msk.bf16.vlgmr.msra.gmra.mxu0 %vm398_vm0, %v391_v10  ;;  %1315 = vmatmul.mubr.msk.bf16.vlgmr.msra.gmra.mxu1 %vm398_vm0, %v1476_v8 }
  0x54   : > { %470 = vperm.xlu0 %1474, %v466_v11  }
  0xcb   : > { %v396_v12 = vpop.permute.xlu0 %395  ;;  %v476_v28 = vpop.permute.xlu1 %475 }
  0xcf   : > { %v471_v16 = vpop.permute.xlu0 %470 }
 0x112   : > { %v436_v19 = vpop.f32.mrf.mxu0  ;;  %v520_v20 = vpop.f32.mrf.mxu1 }
 0x113   : > { %v437_v21 = vadd.f32 %v436_v19, %v396_v12  ;;  %v521_v24 = vadd.f32 %v520_v20, %v471_v16 }
 0x114   : > { %v438_v22 = vpop.f32.mrf.mxu0  ;;  %v522_v23 = vpop.f32.mrf.mxu1 }
 0x115   : > { %v439_v25 = vadd.f32 %v438_v22, %v396_v12  ;;  %v523_v27 = vadd.f32 %v522_v23, %v471_v16 }
 0x116   : > { %v440_v29 = vpop.f32.mrf.mxu0  ;;  %v524_v30 = vpop.f32.mrf.mxu1 }
 0x117   : > { %v1312_v31 = vpack.c.bf16 %v439_v25, %v437_v21  ;;  %v1344_v32 = vpack.c.bf16 %v523_v27, %v521_v24  ;;  %v525_v36 = vadd.f32 %v524_v30, %v476_v28 }
 0x118   : > { %v441_v33 = vpop.f32.mrf.mxu0  ;;  %v526_v34 = vpop.f32.mrf.mxu1 }
 0x119   : > { %v454_v35 = vrot.slane %v1312_v31, %v453_v26  ;;  %541 = vst [vmem:[#allocation3] sm:$0xff] %v1344_v32  ;;  %v527_v37 = vadd.f32 %v526_v34, %v476_v28 }
 0x11b   : > { %1313 = vst.sshfl [vmem:[#allocation2] sm:$0x5 pattern:$0x73625140] %v454_v35  ;;  %v1345_v38 = vpack.c.bf16 %v527_v37, %v525_v36 }
 0x11d   : > { %542 = vst [vmem:[#allocation3 + $0x8] sm:$0xff] %v1345_v38 }
 0x11e PF: > { %s1318_s29 = sshll.u32 %s1739_s17, 7  ;;  %v1762_v39 = vmov 0.0   ;;  %vm1763_vm1 = vmmov 0   ;;  %s2403_s2 = sld [smem:[#allocation22_spill]]  ;;  %v1764_v41 = vmov 0   ;;  %vm558_vm2 = vcmask 130048  }
 0x11f   : > { %1349 = vmatprep.subr.bf16.mxu0 %v1762_v39  ;;  %s544_s24 = sshra.s32 %s1318_s29, 7  ;;  %1351 = vmatprep.mubr.msk.bf16.mxu0 %vm1763_vm1, %v1762_v39  ;;  %s2404_s1 = sld [smem:[#allocation21_spill]]  ;;  %v632_v47 = vlaneseq  ;;  %v1765_v48 = vmov 1966171168   ;;  %vm668_vm3 = vcmask 1040384   ;;  %vm643_vm4 = vcmask 15360  }
 0x120   : > { %s1319_s26 = sshll.u32 %s544_s24, 3  ;;  %1477 = vset.pattern.permute.xlu0 %v1764_v41  ;;  %707 = vmatprep.mubr.bf16.mxu1 %v1764_v41  ;;  %v630_v49 = vunpack.c.l.s4 %v1765_v48  ;;  %s1346_s14 = sshll.u32 %s1739_s17, 5 }
 0x121   : > { %s547_s19 = scalar_lea.vmem %s1944_s10, %s1319_s26 [#allocation5]  ;;  %v633_v50 = vshrl.u32 %v632_v47, 7  ;;  %s2405_s10 = sld [smem:[#allocation14_spill]] }
 0x122   : > { %v1984_v42 = vld [vmem:[%s547_s19] sm:$0xff]  ;;  %v1986_v43 = vld [vmem:[%s547_s19 + $0x10] sm:$0xff]  ;;  %v631_v52 = vunpack.c.0.s8 %v630_v49  ;;  %s1176_s7 = sshll.u32 %s1957_s22, 4  ;;  %s2407_s21 = sld [smem:[#allocation24_spill]]  ;;  %s2265_s7 = int_to_ptr.vmem [resolvable:$true] %s1176_s7 }
 0x123   : > { %v551_v44 = vpack.c.bf16 %v1986_v43, %v1984_v42  ;;  %v1321_v46 = vld.sshfl [vmem:[#allocation2] sm:$0x11 pattern:$0x75316420]  ;;  %s1143_s0 = scalar_lea.sflag [#allocation10], %s1951_s28 }
 0x124   : > { %v552_v40 = vld [vmem:[%s2403_s2] sm:$0x3]  ;;  %v628_v51 = vcombine.high %v1321_v46, %v1321_v46  ;;  %v634_v53 = vsub.s32 %v631_v52, %v633_v50  ;;  %s1766_s2 = smov [#allocation9]  }
 0x125   : > { %555 = vperm.xlu0 %1477, %v552_v40   ;;  %1350 = vmatpush3.bf16.msra.mxu0 %v551_v44  ;;  %v550_v45 = vld [vmem:[%s2404_s1] sm:$0x1]  ;;  %s1605_s1 = scalar_lea.vmem %s2265_s7, 4096 }
 0x126   : > { %v642_v54 = vrot.slane %v628_v51, %v634_v53  ;;  %v635_v55 = vrot.slane %v1321_v46, %v634_v53  ;;  %p1606_p7 = scmp.ne.s32.totalorder %s2265_s7, %s1605_s1 }
 0x127   : > { %s1339_s29 = sshll.u32 %s2405_s10, 6 }
 0x128   : > { %1352 = vmatmul.mubr.msk.bf16.vlgmr.msra.gmra.mxu0 %vm558_vm2, %v550_v45  ;;  %1322 = vmatprep.subr.msk.bf16.mxu1 %vm668_vm3, %v642_v54  ;;  %v670_v56 = vsel %vm668_vm3, %v635_v55, 0  ;;  %s1173_s24 = sadd.s32 %s1346_s14, %s1339_s29  ;;  %p1607_p5 = pnand %p1606_p7, %p1907_p12 }
 0x129   : > { %690 = vmatpush1.bf16.msra.mxu1 %v670_v56  ;;  %s1340_s27 = sshll.u32 %s1173_s24, 7  ;;  %s1609_s14 = sshll.u32 %s1766_s2, 4  ;;  %s1610_s14 = int_to_ptr.vmem [resolvable:$false] %s1609_s14 }
 0x12a   : > { %s2263_s30 = scalar_lea.hbm %s2407_s21, %s1340_s27  ;;  %p1608_p8 = pneg %p1607_p5 }
 0x12b   : > { %p1612_p9 = scmp.lt.s32.totalorder %s2265_s7, %s1610_s14 }
 0x1a0   : > { %v556_v57 = vpop.permute.xlu0 %555 }
 0x1e8   : > { %v596_v58 = vpop.f32.mrf.mxu0 }
 0x1e9   : > { %v597_v59 = vadd.f32 %v596_v58, %v556_v57 }
 0x1ea   : > { %v1353_v60 = vpop.f32.mrf.mxu0 }
 0x1eb   : > { %v602_v61 = vpack.c.bf16 %v597_v59, %v597_v59 }
 0x1ec   : > { %v599_v62 = vpop.f32.mrf.mxu0 }
 0x1ed   : > { %604 = vxpose.xlu0.c.b16.start.end [1/1] (short) %v602_v61, 128 }
 0x1ee   : > { %v1354_v63 = vpop.f32.mrf.mxu0 }
 0x24f   : > { %v612_v0 = vpop.trf.xlu0 }
 0x250   : > { %1323 = vmatmul.mubr.msk.bf16.vlgmr.msra.gmra.mxu1 %vm643_vm4, %v612_v0 }
 0x251   : > { %717 = vmatprep.mubr.bf16.mxu1 %v1764_v41 }
 0x253   : > { %v613_v1 = vpop.trf.xlu0 }
 0x257   : > { %v614_v2 = vpop.trf.xlu0 }
 0x258   : > { %1324 = vmatmul.mubr.msk.bf16.gmra.mxu1 %vm643_vm4, %v613_v1 }
 0x259   : > { %727 = vmatprep.mubr.bf16.mxu1 %v1764_v41 }
 0x25b   : > { %v615_v3 = vpop.trf.xlu0 }
 0x25f   : > { %v616_v4 = vpop.trf.xlu0 }
 0x260   : > { %1325 = vmatmul.mubr.msk.bf16.gmra.mxu1 %vm643_vm4, %v614_v2 }
 0x261   : > { %737 = vmatprep.mubr.bf16.mxu1 %v1764_v41 }
 0x263   : > { %v617_v5 = vpop.trf.xlu0 }
 0x267   : > { %v618_v6 = vpop.trf.xlu0 }
 0x268   : > { %1326 = vmatmul.mubr.msk.bf16.gmra.mxu1 %vm643_vm4, %v615_v3 }
 0x269   : > { %747 = vmatprep.mubr.bf16.mxu1 %v1764_v41 }
 0x26b   : > { %v619_v7 = vpop.trf.xlu0 }
 0x270   : > { %1327 = vmatmul.mubr.msk.bf16.gmra.mxu1 %vm643_vm4, %v616_v4 }
 0x271   : > { %757 = vmatprep.mubr.bf16.mxu1 %v1764_v41 }
 0x278   : > { %1328 = vmatmul.mubr.msk.bf16.gmra.mxu1 %vm643_vm4, %v617_v5 }
 0x279   : > { %767 = vmatprep.mubr.bf16.mxu1 %v1764_v41 }
 0x280   : > { %1329 = vmatmul.mubr.msk.bf16.gmra.mxu1 %vm643_vm4, %v618_v6 }
 0x281   : > { %777 = vmatprep.mubr.bf16.mxu1 %v1764_v41 }
 0x288   : > { %1330 = vmatmul.mubr.msk.bf16.gmra.mxu1 %vm643_vm4, %v619_v7 }
 0x310   : > { %v2001_v8 = vpop.f32.mrf.mxu1 }
 0x312   : > { %v2003_v9 = vpop.f32.mrf.mxu1 }
 0x313   : > { %v788_v56 = vmax.f32 %v2001_v8, %v2003_v9 }
 0x314   : > { %v2005_v10 = vpop.f32.mrf.mxu1 }
 0x316   : > { %v2007_v11 = vpop.f32.mrf.mxu1 }
 0x317   : > { %v791_v57 = vmax.f32 %v2005_v10, %v2007_v11 }
 0x318   : > { %v2009_v12 = vpop.f32.mrf.mxu1 }
 0x31a   : > { %v2011_v13 = vpop.f32.mrf.mxu1 }
 0x31b   : > { %v794_v54 = vmax.f32 %v2009_v12, %v2011_v13 }
 0x31c   : > { %v2013_v14 = vpop.f32.mrf.mxu1 }
 0x31e   : > { %v2015_v15 = vpop.f32.mrf.mxu1 }
 0x31f   : > { %v797_v55 = vmax.f32 %v2013_v14, %v2015_v15 }
 0x320   : > { %v2017_v16 = vpop.f32.mrf.mxu1 }
 0x322   : > { %v2019_v17 = vpop.f32.mrf.mxu1 }
 0x323   : > { %v800_v52 = vmax.f32 %v2017_v16, %v2019_v17 }
 0x324   : > { %v2021_v18 = vpop.f32.mrf.mxu1 }
 0x326   : > { %v2023_v19 = vpop.f32.mrf.mxu1 }
 0x327   : > { %v803_v53 = vmax.f32 %v2021_v18, %v2023_v19 }
 0x328   : > { %v2025_v20 = vpop.f32.mrf.mxu1 }
 0x32a   : > { %v2027_v21 = vpop.f32.mrf.mxu1 }
 0x32b   : > { %v806_v51 = vmax.f32 %v2025_v20, %v2027_v21 }
 0x32c   : > { %v2029_v22 = vpop.f32.mrf.mxu1 }
 0x32e   : > { %v2031_v23 = vpop.f32.mrf.mxu1 }
 0x32f   : > { %v809_v24 = vmax.f32 %v2029_v22, %v2031_v23 }
 0x330   : > { %v2035_v25 = vpop.f32.mrf.mxu1 }
 0x331   : > { %810 = vmax.xlane.f32.xlu0 %v809_v24 }
 0x332   : > { %v2037_v26 = vpop.f32.mrf.mxu1 }
 0x333   : > { %v812_v49 = vmax.f32 %v2035_v25, %v2037_v26 }
 0x334   : > { %v2039_v27 = vpop.f32.mrf.mxu1 }
 0x336   : > { %v2041_v28 = vpop.f32.mrf.mxu1 }
 0x337   : > { %v815_v50 = vmax.f32 %v2039_v27, %v2041_v28 }
 0x338   : > { %v2043_v29 = vpop.f32.mrf.mxu1 }
 0x33a   : > { %v2045_v30 = vpop.f32.mrf.mxu1 }
 0x33b   : > { %v818_v47 = vmax.f32 %v2043_v29, %v2045_v30 }
 0x33c   : > { %v2047_v31 = vpop.f32.mrf.mxu1 }
 0x33e   : > { %v2049_v32 = vpop.f32.mrf.mxu1 }
 0x33f   : > { %v821_v48 = vmax.f32 %v2047_v31, %v2049_v32 }
 0x340   : > { %v769_v33 = vpop.f32.mrf.mxu1 }
 0x342   : > { %v771_v34 = vpop.f32.mrf.mxu1 }
 0x343   : > { %v824_v45 = vmax.f32 %v769_v33, %v771_v34 }
 0x344   : > { %v773_v35 = vpop.f32.mrf.mxu1 }
 0x346   : > { %v775_v36 = vpop.f32.mrf.mxu1 }
 0x347   : > { %v827_v46 = vmax.f32 %v773_v35, %v775_v36 }
 0x348   : > { %v779_v37 = vpop.f32.mrf.mxu1 }
 0x34a   : > { %v781_v38 = vpop.f32.mrf.mxu1 }
 0x34b   : > { %v830_v39 = vmax.f32 %v779_v37, %v781_v38 }
 0x34c   : > { %v783_v40 = vpop.f32.mrf.mxu1 }
 0x34d   : > { %831 = vmax.xlane.f32.xlu1 %v830_v39 }
 0x34e   : > { %v785_v41 = vpop.f32.mrf.mxu1 }
 0x34f   : > { %v833_v44 = vmax.f32 %v783_v40, %v785_v41 }
 0x351   : > { %834 = vmax.xlane.f32.xlu1 %v833_v44 }
 0x355   : > { %825 = vmax.xlane.f32.xlu1 %v824_v45 }
 0x359   : > { %828 = vmax.xlane.f32.xlu1 %v827_v46 }
 0x35d   : > { %819 = vmax.xlane.f32.xlu1 %v818_v47 }
 0x361   : > { %822 = vmax.xlane.f32.xlu1 %v821_v48 }
 0x365   : > { %813 = vmax.xlane.f32.xlu1 %v812_v49 }
 0x369   : > { %816 = vmax.xlane.f32.xlu1 %v815_v50 }
 0x36d   : > { %807 = vmax.xlane.f32.xlu1 %v806_v51 }
 0x371   : > { %801 = vmax.xlane.f32.xlu1 %v800_v52 }
 0x375   : > { %804 = vmax.xlane.f32.xlu1 %v803_v53 }
 0x379   : > { %795 = vmax.xlane.f32.xlu1 %v794_v54 }
 0x37d   : > { %798 = vmax.xlane.f32.xlu1 %v797_v55 }
 0x381   : > { %789 = vmax.xlane.f32.xlu1 %v788_v56 }
 0x385   : > { %792 = vmax.xlane.f32.xlu1 %v791_v57 }
 0x3ba   : > { %v811_v53 = vpop.xlane.xlu0 %810 }
 0x3d6   : > { %v832_v58 = vpop.xlane.xlu1 %831 }
 0x3d7   : > { %v864_v59 = vsub.f32 %v779_v37, %v832_v58  ;;  %v865_v60 = vsub.f32 %v781_v38, %v832_v58  ;;  %v850_v58 = vsub.f32 %v2029_v22, %v811_v53 }
 0x3d9   : > { %v924_v61 = vmul.f32 1.442695, %v864_v59  ;;  %v926_v62 = vmul.f32 1.442695, %v865_v60  ;;  %v896_v22 = vmul.f32 1.442695, %v850_v58 }
 0x3da   : > { %v835_v63 = vpop.xlane.xlu1 %834 }
 0x3db   : > { %1481 = vpow2.f32 %v924_v61  ;;  %v866_v0 = vsub.f32 %v783_v40, %v835_v63  ;;  %v867_v1 = vsub.f32 %v785_v41, %v835_v63  ;;  %v851_v61 = vsub.f32 %v2031_v23, %v811_v53 }
 0x3dc   : > { %1483 = vpow2.f32 %v926_v62 }
 0x3dd   : > { %v928_v2 = vmul.f32 1.442695, %v866_v0  ;;  %v930_v3 = vmul.f32 1.442695, %v867_v1 }
 0x3de   : > { %v826_v4 = vpop.xlane.xlu1 %825 }
 0x3df   : > { %1485 = vpow2.f32 %v928_v2  ;;  %v860_v5 = vsub.f32 %v769_v33, %v826_v4  ;;  %v861_v6 = vsub.f32 %v771_v34, %v826_v4  ;;  %v898_v4 = vmul.f32 1.442695, %v851_v61 }
 0x3e0   : > { %1487 = vpow2.f32 %v930_v3 }
 0x3e1   : > { %v916_v7 = vmul.f32 1.442695, %v860_v5  ;;  %v918_v24 = vmul.f32 1.442695, %v861_v6 }
 0x3e2   : > { %v829_v39 = vpop.xlane.xlu1 %828 }
 0x3e3   : > { %1489 = vpow2.f32 %v916_v7  ;;  %v862_v37 = vsub.f32 %v773_v35, %v829_v39  ;;  %v863_v38 = vsub.f32 %v775_v36, %v829_v39 }
 0x3e4   : > { %1491 = vpow2.f32 %v918_v24 }
 0x3e5   : > { %v920_v44 = vmul.f32 1.442695, %v862_v37  ;;  %v922_v45 = vmul.f32 1.442695, %v863_v38 }
 0x3e6   : > { %v820_v46 = vpop.xlane.xlu1 %819 }
 0x3e7   : > { %1493 = vpow2.f32 %v920_v44  ;;  %v856_v40 = vsub.f32 %v2043_v29, %v820_v46  ;;  %v857_v41 = vsub.f32 %v2045_v30, %v820_v46 }
 0x3e8   : > { %v2075_v47 = vpop.eup %1481  ;;  %1495 = vpow2.f32 %v922_v45 }
 0x3e9   : > { %v2077_v33 = vpop.eup %1483  ;;  %v908_v34 = vmul.f32 1.442695, %v856_v40  ;;  %v910_v48 = vmul.f32 1.442695, %v857_v41 }
 0x3ea   : > { %v823_v49 = vpop.xlane.xlu1 %822  ;;  %v974_v35 = vadd.f32 %v2077_v33, %v2075_v47 }
 0x3eb   : > { %1497 = vpow2.f32 %v908_v34  ;;  %v858_v36 = vsub.f32 %v2047_v31, %v823_v49  ;;  %v859_v50 = vsub.f32 %v2049_v32, %v823_v49 }
 0x3ec   : > { %v2083_v51 = vpop.eup %1485  ;;  %1499 = vpow2.f32 %v910_v48  ;;  %975 = vadd.xlane.f32.xlu1 %v974_v35 }
 0x3ed   : > { %v2085_v29 = vpop.eup %1487  ;;  %v912_v30 = vmul.f32 1.442695, %v858_v36  ;;  %v914_v52 = vmul.f32 1.442695, %v859_v50 }
 0x3ee   : > { %v814_v54 = vpop.xlane.xlu1 %813  ;;  %v977_v55 = vadd.f32 %v2085_v29, %v2083_v51 }
 0x3ef   : > { %1501 = vpow2.f32 %v912_v30  ;;  %v852_v56 = vsub.f32 %v2035_v25, %v814_v54  ;;  %v853_v31 = vsub.f32 %v2037_v26, %v814_v54 }
 0x3f0   : > { %v2091_v57 = vpop.eup %1489  ;;  %1503 = vpow2.f32 %v914_v52  ;;  %978 = vadd.xlane.f32.xlu1 %v977_v55 }
 0x3f1   : > { %v2093_v32 = vpop.eup %1491  ;;  %v900_v59 = vmul.f32 1.442695, %v852_v56  ;;  %v902_v60 = vmul.f32 1.442695, %v853_v31 }
 0x3f2   : > { %v817_v62 = vpop.xlane.xlu1 %816  ;;  %v968_v63 = vadd.f32 %v2093_v32, %v2091_v57 }
 0x3f3   : > { %1505 = vpow2.f32 %v900_v59  ;;  %v854_v25 = vsub.f32 %v2039_v27, %v817_v62  ;;  %v855_v26 = vsub.f32 %v2041_v28, %v817_v62 }
 0x3f4   : > { %v2101_v0 = vpop.eup %1493  ;;  %1507 = vpow2.f32 %v902_v60  ;;  %969 = vadd.xlane.f32.xlu1 %v968_v63 }
 0x3f5   : > { %v2103_v1 = vpop.eup %1495  ;;  %v904_v2 = vmul.f32 1.442695, %v854_v25  ;;  %v906_v3 = vmul.f32 1.442695, %v855_v26 }
 0x3f6   : > { %v808_v23 = vpop.xlane.xlu1 %807  ;;  %v971_v5 = vadd.f32 %v2103_v1, %v2101_v0 }
 0x3f7   : > { %1509 = vpow2.f32 %v904_v2  ;;  %v848_v6 = vsub.f32 %v2025_v20, %v808_v23  ;;  %v849_v27 = vsub.f32 %v2027_v21, %v808_v23 }
 0x3f8   : > { %v2109_v28 = vpop.eup %1497  ;;  %1511 = vpow2.f32 %v906_v3  ;;  %972 = vadd.xlane.f32.xlu1 %v971_v5 }
 0x3f9   : > { %v2111_v7 = vpop.eup %1499  ;;  %1513 = vpow2.f32 %v896_v22  ;;  %v892_v24 = vmul.f32 1.442695, %v848_v6  ;;  %v894_v39 = vmul.f32 1.442695, %v849_v27 }
 0x3fa   : > { %1515 = vpow2.f32 %v898_v4  ;;  %v802_v37 = vpop.xlane.xlu1 %801  ;;  %v962_v38 = vadd.f32 %v2111_v7, %v2109_v28 }
 0x3fb   : > { %1517 = vpow2.f32 %v892_v24  ;;  %v844_v44 = vsub.f32 %v2017_v16, %v802_v37  ;;  %v845_v20 = vsub.f32 %v2019_v17, %v802_v37 }
 0x3fc   : > { %v2117_v21 = vpop.eup %1501  ;;  %1519 = vpow2.f32 %v894_v39  ;;  %963 = vadd.xlane.f32.xlu0 %v962_v38 }
 0x3fd   : > { %v2119_v45 = vpop.eup %1503  ;;  %v884_v46 = vmul.f32 1.442695, %v844_v44  ;;  %v886_v40 = vmul.f32 1.442695, %v845_v20 }
 0x3fe   : > { %v805_v41 = vpop.xlane.xlu1 %804  ;;  %v965_v34 = vadd.f32 %v2119_v45, %v2117_v21 }
 0x3ff   : > { %1521 = vpow2.f32 %v884_v46  ;;  %v846_v48 = vsub.f32 %v2021_v18, %v805_v41  ;;  %v847_v49 = vsub.f32 %v2023_v19, %v805_v41 }
 0x400   : > { %v2125_v16 = vpop.eup %1505  ;;  %1523 = vpow2.f32 %v886_v40  ;;  %966 = vadd.xlane.f32.xlu1 %v965_v34 }
 0x401   : > { %v2127_v17 = vpop.eup %1507  ;;  %v888_v35 = vmul.f32 1.442695, %v846_v48  ;;  %v890_v36 = vmul.f32 1.442695, %v847_v49 }
 0x402   : > { %v796_v50 = vpop.xlane.xlu1 %795  ;;  %v956_v30 = vadd.f32 %v2127_v17, %v2125_v16 }
 0x403   : > { %1525 = vpow2.f32 %v888_v35  ;;  %v840_v52 = vsub.f32 %v2009_v12, %v796_v50  ;;  %v841_v53 = vsub.f32 %v2011_v13, %v796_v50  ;;  %v1480_v50 = vld [vmem:[#allocation3 + $0x4] ss:$8 sps:$4 sm:$0xff]  }
 0x404   : > { %v2133_v18 = vpop.eup %1509  ;;  %1527 = vpow2.f32 %v890_v36  ;;  %957 = vadd.xlane.f32.xlu0 %v956_v30  ;;  %1088 = vmatprep.mubr.bf16.mxu0 %v1480_v50 }
 0x405   : > { %v2135_v19 = vpop.eup %1511  ;;  %v876_v54 = vmul.f32 1.442695, %v840_v52  ;;  %v878_v55 = vmul.f32 1.442695, %v841_v53 }
 0x406   : > { %v2137_v56 = vpop.eup %1513  ;;  %v799_v31 = vpop.xlane.xlu1 %798  ;;  %v959_v58 = vadd.f32 %v2135_v19, %v2133_v18 }
 0x407   : > { %v2141_v59 = vpop.eup %1515  ;;  %1529 = vpow2.f32 %v876_v54  ;;  %v842_v12 = vsub.f32 %v2013_v14, %v799_v31  ;;  %v843_v13 = vsub.f32 %v2015_v15, %v799_v31 }
 0x408   : > { %v2145_v60 = vpop.eup %1517  ;;  %1531 = vpow2.f32 %v878_v55  ;;  %960 = vadd.xlane.f32.xlu1 %v959_v58  ;;  %v953_v22 = vadd.f32 %v2141_v59, %v2137_v56 }
 0x409   : > { %v2147_v61 = vpop.eup %1519  ;;  %v880_v62 = vmul.f32 1.442695, %v842_v12  ;;  %v882_v63 = vmul.f32 1.442695, %v843_v13 }
 0x40a   : > { %v790_v25 = vpop.xlane.xlu1 %789  ;;  %v950_v26 = vadd.f32 %v2147_v61, %v2145_v60 }
 0x40b   : > { %1533 = vpow2.f32 %v880_v62  ;;  %v836_v14 = vsub.f32 %v2001_v8, %v790_v25  ;;  %v837_v15 = vsub.f32 %v2003_v9, %v790_v25 }
 0x40c   : > { %v2155_v2 = vpop.eup %1521  ;;  %1535 = vpow2.f32 %v882_v63  ;;  %951 = vadd.xlane.f32.xlu0 %v950_v26  ;;  %954 = vadd.xlane.f32.xlu1 %v953_v22 }
 0x40d   : > { %v2157_v3 = vpop.eup %1523  ;;  %v868_v4 = vmul.f32 1.442695, %v836_v14  ;;  %v870_v23 = vmul.f32 1.442695, %v837_v15 }
 0x40e   : > { %v793_v5 = vpop.xlane.xlu1 %792  ;;  %v944_v6 = vadd.f32 %v2157_v3, %v2155_v2 }
 0x40f   : > { %1537 = vpow2.f32 %v868_v4  ;;  %v838_v27 = vsub.f32 %v2005_v10, %v793_v5  ;;  %v839_v8 = vsub.f32 %v2007_v11, %v793_v5 }
 0x410   : > { %v2163_v24 = vpop.eup %1525  ;;  %1539 = vpow2.f32 %v870_v23  ;;  %945 = vadd.xlane.f32.xlu0 %v944_v6 }
 0x411   : > { %v2165_v9 = vpop.eup %1527  ;;  %v872_v39 = vmul.f32 1.442695, %v838_v27  ;;  %v874_v37 = vmul.f32 1.442695, %v839_v8 }
 0x412   : > { %v947_v38 = vadd.f32 %v2165_v9, %v2163_v24 }
 0x413   : > { %1541 = vpow2.f32 %v872_v39 }
 0x414   : > { %v2169_v44 = vpop.eup %1529  ;;  %1543 = vpow2.f32 %v874_v37  ;;  %948 = vadd.xlane.f32.xlu1 %v947_v38 }
 0x415   : > { %v2171_v20 = vpop.eup %1531 }
 0x416   : > { %v938_v10 = vadd.f32 %v2171_v20, %v2169_v44 }
 0x418   : > { %v2175_v11 = vpop.eup %1533  ;;  %939 = vadd.xlane.f32.xlu0 %v938_v10 }
 0x419   : > { %v2177_v46 = vpop.eup %1535 }
 0x41a   : > { %v941_v40 = vadd.f32 %v2177_v46, %v2175_v11 }
 0x41c   : > { %v2181_v41 = vpop.eup %1537  ;;  %942 = vadd.xlane.f32.xlu1 %v941_v40 }
 0x41d   : > { %v2183_v34 = vpop.eup %1539 }
 0x41e   : > { %v932_v48 = vadd.f32 %v2183_v34, %v2181_v41 }
 0x420   : > { %v2187_v49 = vpop.eup %1541  ;;  %933 = vadd.xlane.f32.xlu0 %v932_v48 }
 0x421   : > { %v2189_v35 = vpop.eup %1543 }
 0x422   : > { %v935_v36 = vadd.f32 %v2189_v35, %v2187_v49 }
 0x424   : > { %936 = vadd.xlane.f32.xlu1 %v935_v36 }
 0x475   : > { %v976_v30 = vpop.xlane.xlu1 %975 }
 0x476   : > { %1545 = vrcp.f32 %v976_v30 }
 0x479   : > { %v979_v52 = vpop.xlane.xlu1 %978 }
 0x47a   : > { %1547 = vrcp.f32 %v979_v52 }
 0x47d   : > { %v970_v53 = vpop.xlane.xlu1 %969 }
 0x47e   : > { %1549 = vrcp.f32 %v970_v53 }
 0x481   : > { %v973_v54 = vpop.xlane.xlu1 %972 }
 0x482   : > { %1551 = vrcp.f32 %v973_v54 }
 0x483   : > { %v1546_v55 = vpop.eup %1545 }
 0x484   : > { %v1025_v31 = vmul.f32 %v1546_v55, %v2077_v33  ;;  %v1024_v58 = vmul.f32 %v1546_v55, %v2075_v47 }
 0x485   : > { %v964_v12 = vpop.xlane.xlu0 %963 }
 0x486   : > { %1553 = vrcp.f32 %v964_v12  ;;  %1134 = vst [vmem:[%s1957_s22 + $0xe8] sm:$0xff] %v1025_v31  ;;  %1133 = vst [vmem:[%s1957_s22 + $0xe0] sm:$0xff] %v1024_v58 }
 0x487   : > { %v1548_v13 = vpop.eup %1547 }
 0x488   : > { %v1027_v62 = vmul.f32 %v1548_v13, %v2085_v29  ;;  %v1026_v63 = vmul.f32 %v1548_v13, %v2083_v51 }
 0x489   : > { %v967_v25 = vpop.xlane.xlu1 %966 }
 0x48a   : > { %1555 = vrcp.f32 %v967_v25  ;;  %v1045_v26 = vpack.c.bf16 %v1027_v62, %v1025_v31  ;;  %1136 = vst [vmem:[%s1957_s22 + $0xf8] sm:$0xff] %v1027_v62  ;;  %v1044_v22 = vpack.c.bf16 %v1026_v63, %v1024_v58  ;;  %1135 = vst [vmem:[%s1957_s22 + $0xf0] sm:$0xff] %v1026_v63 }
 0x48b   : > { %v1550_v33 = vpop.eup %1549 }
 0x48c   : > { %1056 = vmatprep.subr.bf16.mxu0 %v1045_v26  ;;  %v1021_v47 = vmul.f32 %v1550_v33, %v2093_v32  ;;  %v1020_v14 = vmul.f32 %v1550_v33, %v2091_v57 }
 0x48d   : > { %1057 = vmatpush1.bf16.xpose.msra.mxu0 %v1044_v22  ;;  %v958_v15 = vpop.xlane.xlu0 %957 }
 0x48e   : > { %1557 = vrcp.f32 %v958_v15  ;;  %1130 = vst [vmem:[%s1957_s22 + $0xc8] sm:$0xff] %v1021_v47  ;;  %1129 = vst [vmem:[%s1957_s22 + $0xc0] sm:$0xff] %v1020_v14 }
 0x48f   : > { %v1552_v51 = vpop.eup %1551 }
 0x490   : > { %v1023_v29 = vmul.f32 %v1552_v51, %v2103_v1  ;;  %v1022_v4 = vmul.f32 %v1552_v51, %v2101_v0 }
 0x491   : > { %v961_v23 = vpop.xlane.xlu1 %960 }
 0x492   : > { %1559 = vrcp.f32 %v961_v23  ;;  %v1043_v5 = vpack.c.bf16 %v1023_v29, %v1021_v47  ;;  %1132 = vst [vmem:[%s1957_s22 + $0xd8] sm:$0xff] %v1023_v29  ;;  %v1042_v6 = vpack.c.bf16 %v1022_v4, %v1020_v14  ;;  %1131 = vst [vmem:[%s1957_s22 + $0xd0] sm:$0xff] %v1022_v4 }
 0x493   : > { %v1554_v32 = vpop.eup %1553 }
 0x494   : > { %1058 = vmatprep.subr.bf16.mxu0 %v1043_v5  ;;  %v1017_v57 = vmul.f32 %v1554_v32, %v2111_v7  ;;  %v1016_v27 = vmul.f32 %v1554_v32, %v2109_v28 }
 0x495   : > { %1059 = vmatpush1.bf16.xpose.msra.mxu0 %v1042_v6  ;;  %v955_v1 = vpop.xlane.xlu1 %954  ;;  %v952_v8 = vpop.xlane.xlu0 %951 }
 0x496   : > { %1561 = vrcp.f32 %v955_v1  ;;  %1126 = vst [vmem:[%s1957_s22 + $0xa8] sm:$0xff] %v1017_v57  ;;  %1125 = vst [vmem:[%s1957_s22 + $0xa0] sm:$0xff] %v1016_v27 }
 0x497   : > { %v1556_v0 = vpop.eup %1555  ;;  %1563 = vrcp.f32 %v952_v8 }
 0x498   : > { %v1019_v39 = vmul.f32 %v1556_v0, %v2119_v45  ;;  %v1018_v37 = vmul.f32 %v1556_v0, %v2117_v21 }
 0x499   : > { %v946_v38 = vpop.xlane.xlu0 %945 }
 0x49a   : > { %1565 = vrcp.f32 %v946_v38  ;;  %v1041_v7 = vpack.c.bf16 %v1019_v39, %v1017_v57  ;;  %1128 = vst [vmem:[%s1957_s22 + $0xb8] sm:$0xff] %v1019_v39  ;;  %v1040_v28 = vpack.c.bf16 %v1018_v37, %v1016_v27  ;;  %1127 = vst [vmem:[%s1957_s22 + $0xb0] sm:$0xff] %v1018_v37 }
 0x49b   : > { %v1558_v10 = vpop.eup %1557 }
 0x49c   : > { %1060 = vmatprep.subr.bf16.mxu0 %v1041_v7  ;;  %v1013_v40 = vmul.f32 %v1558_v10, %v2127_v17  ;;  %v1012_v48 = vmul.f32 %v1558_v10, %v2125_v16 }
 0x49d   : > { %v949_v36 = vpop.xlane.xlu1 %948  ;;  %1061 = vmatpush1.bf16.xpose.msra.mxu0 %v1040_v28 }
 0x49e   : > { %1567 = vrcp.f32 %v949_v36  ;;  %1122 = vst [vmem:[%s1957_s22 + $0x88] sm:$0xff] %v1013_v40  ;;  %1121 = vst [vmem:[%s1957_s22 + $0x80] sm:$0xff] %v1012_v48 }
 0x49f   : > { %v1560_v21 = vpop.eup %1559 }
 0x4a0   : > { %v1015_v45 = vmul.f32 %v1560_v21, %v2135_v19  ;;  %v1014_v50 = vmul.f32 %v1560_v21, %v2133_v18 }
 0x4a1   : > { %v940_v30 = vpop.xlane.xlu0 %939 }
 0x4a2   : > { %1569 = vrcp.f32 %v940_v30  ;;  %v1039_v52 = vpack.c.bf16 %v1015_v45, %v1013_v40  ;;  %1124 = vst [vmem:[%s1957_s22 + $0x98] sm:$0xff] %v1015_v45  ;;  %v1038_v53 = vpack.c.bf16 %v1014_v50, %v1012_v48  ;;  %1123 = vst [vmem:[%s1957_s22 + $0x90] sm:$0xff] %v1014_v50 }
 0x4a3   : > { %v1562_v16 = vpop.eup %1561 }
 0x4a4   : > { %v1564_v17 = vpop.eup %1563  ;;  %1062 = vmatprep.subr.bf16.mxu0 %v1039_v52  ;;  %v1011_v54 = vmul.f32 %v1562_v16, %v2141_v59  ;;  %v1010_v55 = vmul.f32 %v1562_v16, %v2137_v56 }
 0x4a5   : > { %v943_v19 = vpop.xlane.xlu1 %942  ;;  %1063 = vmatpush1.bf16.xpose.msra.mxu0 %v1038_v53  ;;  %v1009_v18 = vmul.f32 %v1564_v17, %v2147_v61  ;;  %v1008_v31 = vmul.f32 %v1564_v17, %v2145_v60 }
 0x4a6   : > { %1571 = vrcp.f32 %v943_v19  ;;  %1120 = vst [vmem:[%s1957_s22 + $0x78] sm:$0xff] %v1011_v54  ;;  %1119 = vst [vmem:[%s1957_s22 + $0x70] sm:$0xff] %v1010_v55 }
 0x4a7   : > { %v1566_v58 = vpop.eup %1565  ;;  %v1037_v12 = vpack.c.bf16 %v1011_v54, %v1009_v18  ;;  %1118 = vst [vmem:[%s1957_s22 + $0x68] sm:$0xff] %v1009_v18  ;;  %1117 = vst [vmem:[%s1957_s22 + $0x60] sm:$0xff] %v1008_v31  ;;  %v1036_v61 = vpack.c.bf16 %v1010_v55, %v1008_v31 }
 0x4a8   : > { %v1005_v59 = vmul.f32 %v1566_v58, %v2157_v3  ;;  %v1004_v56 = vmul.f32 %v1566_v58, %v2155_v2 }
 0x4a9   : > { %1064 = vmatprep.subr.bf16.mxu0 %v1037_v12  ;;  %v934_v13 = vpop.xlane.xlu0 %933 }
 0x4aa   : > { %1573 = vrcp.f32 %v934_v13  ;;  %1114 = vst [vmem:[%s1957_s22 + $0x48] sm:$0xff] %v1005_v59  ;;  %1113 = vst [vmem:[%s1957_s22 + $0x40] sm:$0xff] %v1004_v56 }
 0x4ab   : > { %v1568_v60 = vpop.eup %1567 }
 0x4ac   : > { %v1007_v62 = vmul.f32 %v1568_v60, %v2165_v9  ;;  %v1006_v63 = vmul.f32 %v1568_v60, %v2163_v24 }
 0x4ad   : > { %v937_v25 = vpop.xlane.xlu1 %936  ;;  %1065 = vmatpush1.bf16.xpose.msra.mxu0 %v1036_v61 }
 0x4ae   : > { %1575 = vrcp.f32 %v937_v25  ;;  %v1035_v3 = vpack.c.bf16 %v1007_v62, %v1005_v59  ;;  %1116 = vst [vmem:[%s1957_s22 + $0x58] sm:$0xff] %v1007_v62  ;;  %1115 = vst [vmem:[%s1957_s22 + $0x50] sm:$0xff] %v1006_v63  ;;  %v1034_v24 = vpack.c.bf16 %v1006_v63, %v1004_v56 }
 0x4af   : > { %v1570_v2 = vpop.eup %1569 }
 0x4b0   : > { %1066 = vmatprep.subr.bf16.mxu0 %v1035_v3  ;;  %v1001_v26 = vmul.f32 %v1570_v2, %v2171_v20  ;;  %v1000_v22 = vmul.f32 %v1570_v2, %v2169_v44 }
 0x4b2   : > { %1110 = vst [vmem:[%s1957_s22 + $0x28] sm:$0xff] %v1001_v26  ;;  %1109 = vst [vmem:[%s1957_s22 + $0x20] sm:$0xff] %v1000_v22 }
 0x4b3   : > { %v1572_v9 = vpop.eup %1571 }
 0x4b4   : > { %v1003_v33 = vmul.f32 %v1572_v9, %v2177_v46  ;;  %v1002_v47 = vmul.f32 %v1572_v9, %v2175_v11 }
 0x4b5   : > { %1067 = vmatpush1.bf16.xpose.msra.mxu0 %v1034_v24 }
 0x4b6   : > { %v1033_v14 = vpack.c.bf16 %v1003_v33, %v1001_v26  ;;  %1112 = vst [vmem:[%s1957_s22 + $0x38] sm:$0xff] %v1003_v33  ;;  %1111 = vst [vmem:[%s1957_s22 + $0x30] sm:$0xff] %v1002_v47  ;;  %v1032_v46 = vpack.c.bf16 %v1002_v47, %v1000_v22 }
 0x4b7   : > { %v1574_v15 = vpop.eup %1573 }
 0x4b8   : > { %1068 = vmatprep.subr.bf16.mxu0 %v1033_v14  ;;  %v997_v20 = vmul.f32 %v1574_v15, %v2183_v34  ;;  %v996_v44 = vmul.f32 %v1574_v15, %v2181_v41  ;;  %v1478_v41 = vld [vmem:[#allocation3] ss:$8 sps:$4 sm:$0xff]  }
 0x4ba   : > { %1106 = vst [vmem:[%s1957_s22 + $0x8] sm:$0xff] %v997_v20  ;;  %1105 = vst [vmem:[%s1957_s22] sm:$0xff] %v996_v44 }
 0x4bb   : > { %v1576_v51 = vpop.eup %1575 }
 0x4bc   : > { %v999_v11 = vmul.f32 %v1576_v51, %v2189_v35  ;;  %v998_v29 = vmul.f32 %v1576_v51, %v2187_v49 }
 0x4bd   : > { %1069 = vmatpush1.bf16.xpose.msra.mxu0 %v1032_v46 }
 0x4be   : > { %v1031_v4 = vpack.c.bf16 %v999_v11, %v997_v20  ;;  %1108 = vst [vmem:[%s1957_s22 + $0x18] sm:$0xff] %v999_v11  ;;  %1107 = vst [vmem:[%s1957_s22 + $0x10] sm:$0xff] %v998_v29  ;;  %v1030_v34 = vpack.c.bf16 %v998_v29, %v996_v44  ;;  %s1611_s22 = scalar_lea.vmem %s1610_s14, 8192 }
 0x4bf   : > { %p1613_p10 = scmp.lt.s32.totalorder %s1611_s22, %s1605_s1 }
 0x4c0   : > { %1070 = vmatprep.subr.bf16.mxu0 %v1031_v4 }
 0x4c1   : > { %p1614_p11 = por %p1613_p10, %p1612_p9 }
 0x4c3   : > { %p1615_p13 = pnand %p1614_p11, %p1608_p8 }
 0x4c5   : > { %1071 = vmatpush1.bf16.xpose.msra.mxu0 %v1030_v34 }
 0x4cc   : > { %1089 = vmatmul.mubr.bf16.vlgmr.msra.gmra.mxu0 %v1478_v41 }
 0x4cd   : > { %1618 = shalt.err (!%p1615_p13)
}
 0x4ce   : > { %s1619_s29 = scalar_lea.hbm %s2263_s30, 4096  ;;  %s1623_s2 = scalar_lea.hbm %s2407_s21, 16384 }
 0x4cf   : > { %p1620_p0 = scmp.ne.s32.totalorder %s2263_s30, %s1619_s29  ;;  %p1624_p6 = scmp.lt.s32.totalorder %s2263_s30, %s2407_s21 }
 0x4d0   : > { %p1625_p4 = scmp.lt.s32.totalorder %s1623_s2, %s1619_s29 }
 0x4d1   : > { %p1621_p3 = pnand %p1620_p0, %p1907_p12 }
 0x4d2   : > { %p1626_p7 = por %p1625_p4, %p1624_p6 }
 0x4d3   : > { %p1622_p1 = pneg %p1621_p3 }
 0x4d5   : > { %p1627_p5 = pnand %p1626_p7, %p1622_p1 }
 0x4d7   : > { %1630 = shalt.err (!%p1627_p5)
}
 0x4d8   : > { %s1767_s1 = smov 256   ;;  %s1768_s14 = smov 16  }
 0x4d9   : > { %1358 = dma.vmem_to_hbm [thread:$0]  (%p1907_p12), %s2265_s7, 4096, %s2263_s30, %s1143_s0, %s1767_s1, %s1767_s1, %s1768_s14  }
 0x4da   : > { %s1097_s22 = sld [smem:[#allocation4]]  ;;  %s1335_s29 = sshll.u32 %s2405_s10, 2 }
 0x4db   : > { %s1154_s24 = sadd.s32 %s1739_s17, %s1335_s29  ;;  %s1157_s2 = sshll.u32 %s1955_s25, 4  ;;  %s2302_s2 = int_to_ptr.vmem [resolvable:$true] %s1157_s2 }
 0x4dc   : > { %s1336_s27 = sshll.u32 %s1154_s24, 7  ;;  %s2408_s7 = sld [smem:[#allocation23_spill]] }
 0x4dd   : > { %s1138_s17 = scalar_lea.sflag [#allocation7], %s1951_s28  ;;  %s1631_s19 = scalar_lea.vmem %s2302_s2, 256 }
 0x4de   : > { %p1632_p8 = scmp.ne.s32.totalorder %s2302_s2, %s1631_s19  ;;  %s1769_s14 = smov [#allocation8]  }
 0x4e0   : > { %v1098_v49 = vstv %s1097_s22  ;;  %p1633_p9 = pnand %p1632_p8, %p1907_p12  ;;  %s1635_s22 = sshll.u32 %s1769_s14, 4  ;;  %s1636_s22 = int_to_ptr.vmem [resolvable:$false] %s1635_s22 }
 0x4e1   : > { %s1637_s29 = scalar_lea.vmem %s1636_s22, 512  ;;  %p1638_p11 = scmp.lt.s32.totalorder %s2302_s2, %s1636_s22 }
 0x4e2   : > { %s2409_s30 = smov %s2408_s7  ;;  %s2300_s10 = scalar_lea.hbm %s2408_s7, %s1336_s27 }
 0x4e3   : > { %p1634_p10 = pneg %p1633_p9  ;;  %p1639_p13 = scmp.lt.s32.totalorder %s1637_s29, %s1631_s19 }
 0x4e5   : > { %p1640_p0 = por %p1639_p13, %p1638_p11 }
 0x4e7   : > { %p1641_p3 = pnand %p1640_p0, %p1634_p10 }
 0x58c   : > { %v1090_v35 = vpop.f32.mrf.mxu0 }
 0x58d   : > { %v1099_v23 = vmul.f32 %v1098_v49, %v1090_v35 }
 0x58e   : > { %v1092_v5 = vpop.f32.mrf.mxu0 }
 0x58f   : > { %v1101_v6 = vadd.f32 %v1099_v23, %v1984_v42 }
 0x590   : > { %v1093_v32 = vpop.f32.mrf.mxu0 }
 0x591   : > { %1103 = vst [vmem:[%s1955_s25] sm:$0xff] %v1101_v6  ;;  %v1100_v57 = vmul.f32 %v1098_v49, %v1093_v32 }
 0x592   : > { %v1095_v27 = vpop.f32.mrf.mxu0 }
 0x593   : > { %v1102_v1 = vadd.f32 %v1100_v57, %v1986_v43 }
 0x595   : > { %1104 = vst [vmem:[%s1955_s25 + $0x8] sm:$0xff] %v1102_v1 }
 0x596   : > { %1644 = shalt.err (!%p1641_p3)
}
 0x597   : > { %s1645_s25 = scalar_lea.hbm %s2300_s10, 256  ;;  %s1649_s26 = scalar_lea.hbm %s2409_s30, 1024 }
 0x598   : > { %p1646_p1 = scmp.ne.s32.totalorder %s2300_s10, %s1645_s25  ;;  %p1650_p7 = scmp.lt.s32.totalorder %s2300_s10, %s2409_s30 }
 0x599   : > { %p1651_p5 = scmp.lt.s32.totalorder %s1649_s26, %s1645_s25 }
 0x59a   : > { %p1647_p6 = pnand %p1646_p1, %p1907_p12 }
 0x59b   : > { %p1652_p8 = por %p1651_p5, %p1650_p7 }
 0x59c   : > { %p1648_p4 = pneg %p1647_p6 }
 0x59e   : > { %p1653_p9 = pnand %p1652_p8, %p1648_p4 }
 0x5a0   : > { %1656 = shalt.err (!%p1653_p9)
}
 0x5a1   : > { %s1770_s19 = smov 128   ;;  %s1771_s14 = smov 8  }
 0x5a2   : > { %1357 = dma.vmem_to_hbm [thread:$0]  (%p1907_p12), %s2302_s2, 256, %s2300_s10, %s1138_s17, %s1770_s19, %s1767_s1, %s1771_s14  }
 0x5a3 PF: > { %p1373_p10 = scmp.ge.s32.totalorder %s1755_s20, 2  ;;  %s1191_s22 = sand.u32 1, %s1715_s11  }
 0x5a4   : > { %s1192_s29 = scalar_lea.sflag [#allocation7], %s1191_s22 }
 0x5a5   : > { %p1366_p11 = pnand %p1373_p10, %p1920_p2 }
 0x5a7   : > { %p1367_p13 = pneg %p1366_p11 }
 0x5a9   : > { %1706 = dma.done.wait (%p1367_p13), %s1192_s29, 256  }
 0x5aa   : > { %1708 = vsyncadd (%p1367_p13), %s1192_s29, 4294967040  ;;  %s1201_s25 = scalar_lea.sflag [#allocation10], %s1191_s22 }
 0x5ab   : > { %1710 = dma.done.wait (%p1367_p13), %s1201_s25, 4096  }
 0x5ac   : > { %1712 = vsyncadd (%p1367_p13), %s1201_s25, 4294963200  ;;  %s30_s20 = sadd.s32 1, %s1755_s20   ;;  %s2410_s17 = sld [smem:[#allocation15_spill]] }
 0x5ad   : > { %p27_p0 = scmp.ge.s32.totalorder %s30_s20, 6   ;;  %s2411_s7 = sld [smem:[#allocation16_spill]] }
 0x5ae   : > { %s2412_s8 = sld [smem:[#allocation17_spill]]  ;;  %s2414_s11 = smov %s1719_s12 }
 0x5af   : > { %s2413_s19 = sld [smem:[#allocation18_spill]]  ;;  %s2415_s12 = smov %s1723_s13 }
 0x5b0   : > { %s2416_s13 = smov %s1915_s18  ;;  %s2417_s14 = smov %s1731_s15 }
 0x5b1   : > { %s2418_s15 = smov %s1735_s16  ;;  %s2419_s16 = smov %s1912_s23 }
 0x5b2   :  { %29 = sbr.rel (!%p27_p0) target bundleno = 18 (0x12), region = 119 }
 0x5b4   : > { %s2420_s18 = smov %s2412_s8 }
 0x5b7   :  { %1206 = vsyncpa [#allocation6], 1 }
 0x5b8   :  { %1208 = vsyncpa [#allocation6 + $0x1], 1 }
 0x5b9   :  { %1209 = vsyncpa [#allocation7], 1 }
 0x5ba   :  { %1211 = vsyncpa [#allocation7 + $0x1], 1 }
 0x5bb   :  { %1212 = vsyncpa [#allocation10], 1 }
 0x5bc   :  { %1214 = vsyncpa [#allocation10 + $0x1], 1 }

</bundles_post_ra>
